<compile_context>
chip_gen: v6e
topology: v6e:2x2x1
jax: 0.10.0
libtpu: 0.0.40
codegen_flags: <defaults>
</compile_context>

<pallas_src>
import functools
import math

import jax
import jax.numpy as jnp
from jax.experimental import pallas as pl
from jax.experimental.pallas import tpu as pltpu


HP = 128                 # padded hidden / lane width
ACTION_LANE = 126        # lane of the fused output carrying the sampled action (as f32)
LOGP_LANE = 127          # lane carrying the per-step mean log-prob
W23B_ROWS = 2 * HP + 16  # [W2 ; W3 ; b2 ; b3 ; pad] rows, multiple of 16 for bf16 tiling


def _policy_kernel(state_ref, noise_ref, w1_ref, w23b_ref, out_ref, *, B_valid, A):
    # state_ref : VMEM (1, Bp, 1)  int32  -- per-step integer states (padded rows = 0)
    # noise_ref : VMEM (1, Bp, HP) f32    -- per-step Gumbel(0,1) noise
    # w1_ref    : VMEM (IP, HP)    bf16   -- (W1 + b1), zero-padded (constant block)
    # w23b_ref  : VMEM (W23B_ROWS, HP) bf16 -- [W2p ; W3p ; b2p ; b3p ; pad] (constant)
    # out_ref   : VMEM (1, Bp, HP) f32    -- fused lane-dense output
    Bp = out_ref.shape[1]
    IP = w1_ref.shape[0]

    st = state_ref[0]                                            # (Bp, 1) int32
    g = noise_ref[0]                                             # (Bp, HP) f32

    # ---- layer 1: onehot(state) @ (W1 + b1) as one MXU dot (no scalar gather chain) ----
    col = jax.lax.broadcasted_iota(jnp.int32, (Bp, IP), 1)
    onehot = (col == st).astype(jnp.float32).astype(jnp.bfloat16)   # (Bp, IP)
    h1 = jnp.maximum(
        jnp.dot(onehot, w1_ref[...], preferred_element_type=jnp.float32), 0.0)

    # ---- layers 2 / 3: bf16 weights, f32 accumulate; padded lanes stay exactly 0 ----
    w2 = w23b_ref[0:HP, :]
    w3 = w23b_ref[HP:2 * HP, :]
    b2 = w23b_ref[2 * HP:2 * HP + 1, :].astype(jnp.float32)         # (1, HP)
    b3 = w23b_ref[2 * HP + 1:2 * HP + 2, :].astype(jnp.float32)     # (1, HP)
    h2 = jnp.maximum(
        jnp.dot(h1.astype(jnp.bfloat16), w2, preferred_element_type=jnp.float32) + b2,
        0.0)
    logits_raw = (
        jnp.dot(h2.astype(jnp.bfloat16), w3, preferred_element_type=jnp.float32) + b3)

    lane = jax.lax.broadcasted_iota(jnp.int32, (Bp, HP), 1)
    logits_m = jnp.where(lane < A, logits_raw, jnp.float32(-1e30))   # mask padded lanes

    # ---- Categorical(logits).sample() via exact Gumbel-max ----
    action = jnp.argmax(logits_m + g, axis=-1, keepdims=True)        # (Bp, 1) int32

    # ---- density.log_prob(action).mean() over the valid batch rows ----
    m = jnp.max(logits_m, axis=-1, keepdims=True)
    lse = m + jnp.log(jnp.sum(jnp.exp(logits_m - m), axis=-1, keepdims=True))
    act_oh = (lane == action).astype(jnp.float32)
    logp = jnp.sum(logits_m * act_oh, axis=-1, keepdims=True) - lse   # (Bp, 1)
    row = jax.lax.broadcasted_iota(jnp.int32, (Bp, 1), 0)
    valid = (row < B_valid).astype(jnp.float32)
    mean_logp = jnp.sum(logp * valid) / jnp.float32(B_valid)

    # ---- single unmasked, lane-dense fused store ----
    packed = jnp.where(lane == ACTION_LANE, action.astype(jnp.float32), logits_raw)
    packed = jnp.where(lane == LOGP_LANE, mean_logp, packed)
    out_ref[0] = packed


@functools.partial(jax.jit, static_argnames=("output_size",))
def categorical_policy_rollout(states, noise, packed_params, *, output_size):
    """states: (T, B) int32 state indices; noise: (T, B, HP) f32 Gumbel(0,1) noise.

    Returns (action (T, B) i32, logits (T, B, A) f32, log_prob (T, 1, 1) f32)."""
    w1f, w23b = packed_params
    T, B = states.shape
    A = output_size
    assert A <= ACTION_LANE
    Bp = ((B + 7) // 8) * 8                       # keep sublane-full (8,...) tiles
    IP = w1f.shape[0]

    states_p = jnp.zeros((T, Bp, 1), jnp.int32).at[:, :B, 0].set(states.astype(jnp.int32))
    noise_p = jnp.zeros((T, Bp, HP), jnp.float32).at[:, :B, :].set(
        noise.astype(jnp.float32))

    out = pl.pallas_call(
        functools.partial(_policy_kernel, B_valid=B, A=A),
        out_shape=jax.ShapeDtypeStruct((T, Bp, HP), jnp.float32),
        grid=(T,),
        in_specs=[
            pl.BlockSpec((1, Bp, 1), lambda t: (t, 0, 0)),     # per-step states
            pl.BlockSpec((1, Bp, HP), lambda t: (t, 0, 0)),    # per-step Gumbel noise
            pl.BlockSpec((IP, HP), lambda t: (0, 0)),          # W1+b1: constant, VMEM-resident
            pl.BlockSpec((W23B_ROWS, HP), lambda t: (0, 0)),   # W2/W3/b2/b3: constant
        ],
        out_specs=pl.BlockSpec((1, Bp, HP), lambda t: (t, 0, 0)),
        compiler_params=pltpu.CompilerParams(
            dimension_semantics=("parallel",)),                # v7x: split T across 2 TCs
    )(states_p, noise_p, w1f, w23b)

    logits = out[:, :B, :A]
    action = out[:, :B, ACTION_LANE].astype(jnp.int32)
    log_prob = out[:, 0, LOGP_LANE].reshape(T, 1, 1)
    return action, logits, log_prob


def _xavier_uniform(key, fan_in, fan_out):
    bound = math.sqrt(6.0 / (fan_in + fan_out))
    return jax.random.uniform(key, (fan_in, fan_out), jnp.float32, -bound, bound)


def init_params(key, input_size, output_size, hiddens=None):
    """Xavier-uniform weights (in, out) and zero biases, matching linear_init()."""
    if hiddens is None:
        hiddens = [100, 100]
    dims = [input_size] + list(hiddens) + [output_size]
    params = []
    for fi, fo in zip(dims[:-1], dims[1:]):
        key, sub = jax.random.split(key)
        params.append(_xavier_uniform(sub, fi, fo))
        params.append(jnp.zeros((1, fo), jnp.float32))
    return tuple(params)


def pack_params(params, input_size, output_size):
    """Pack the 6 parameter arrays into 2 lane-dense, 128-padded bf16 slabs."""
    w1, b1, w2, b2, w3, b3 = params
    h1d, h2d = w1.shape[1], w2.shape[1]
    assert h1d <= HP and h2d <= HP and output_size <= ACTION_LANE

    IP = ((max(input_size, 1) + HP - 1) // HP) * HP
    # Layer 1: fold bias into the weight rows (one-hot input -> row select).
    w1f = jnp.zeros((IP, HP), jnp.float32).at[:input_size, :h1d].set(w1 + b1)

    # Layers 2/3 + biases: one contiguous slab; zero padding keeps padded lanes inert.
    w23b = jnp.zeros((W23B_ROWS, HP), jnp.float32)
    w23b = w23b.at[:h1d, :h2d].set(w2)
    w23b = w23b.at[HP:HP + h2d, :output_size].set(w3)
    w23b = w23b.at[2 * HP, :h2d].set(b2[0])
    w23b = w23b.at[2 * HP + 1, :output_size].set(b3[0])
    return w1f.astype(jnp.bfloat16), w23b.astype(jnp.bfloat16)


def _reference_logits_bf16(states, params):
    """Pure-JAX reference matching the kernel's bf16-weight / f32-accumulate math."""
    w1, b1, w2, b2, w3, b3 = params
    bf = jnp.bfloat16
    w1fb = (w1 + b1).astype(bf).astype(jnp.float32)
    h1 = jnp.maximum(w1fb[states], 0.0)
    h2 = jnp.maximum(
        jnp.dot(h1.astype(bf), w2.astype(bf), preferred_element_type=jnp.float32)
        + b2.astype(bf).astype(jnp.float32), 0.0)
    return (jnp.dot(h2.astype(bf), w3.astype(bf), preferred_element_type=jnp.float32)
            + b3.astype(bf).astype(jnp.float32))


if __name__ == "__main__":
    key = jax.random.PRNGKey(0)

    T = 4                 # rollout steps folded into one pallas_call (grid axis)
    B = 8                 # batch of integer states (multiple of 8 sublanes)
    input_size = 16       # discrete state-space size (one-hot dimension)
    output_size = 5       # number of discrete actions
    hiddens = [100, 100]  # module default

    k_state, k_params, k_noise = jax.random.split(key, 3)
    states = jax.random.randint(k_state, (T, B), 0, input_size, dtype=jnp.int32)
    raw_params = init_params(k_params, input_size, output_size, hiddens)
    packed = pack_params(raw_params, input_size, output_size)
    noise = jax.random.gumbel(k_noise, (T, B, HP), jnp.float32)

    action, logits, log_prob = categorical_policy_rollout(
        states, noise, packed, output_size=output_size)
    jax.block_until_ready((action, logits, log_prob))

    # ---- sanity checks against a pure-JAX reference ----
    assert logits.shape == (T, B, output_size)
    assert action.shape == (T, B)
    assert log_prob.shape == (T, 1, 1)

    ref_logits = _reference_logits_bf16(states, raw_params)
    assert jnp.allclose(logits, ref_logits, atol=2e-3, rtol=2e-3), "logits mismatch"

    assert bool(jnp.all((action >= 0) & (action < output_size))), "action out of range"
    # Gumbel-max with the same noise must reproduce the sampled actions exactly.
    ref_action = jnp.argmax(logits + noise[:, :, :output_size], axis=-1).astype(jnp.int32)
    assert bool(jnp.all(action == ref_action)), "sampled action mismatch"

    # log_prob must equal the per-step mean log-softmax of the sampled actions.
    lsm = jax.nn.log_softmax(logits, axis=-1)
    ref_lp = jnp.mean(
        jnp.take_along_axis(lsm, action[..., None], axis=-1), axis=1).reshape(T, 1, 1)
    assert jnp.allclose(log_prob, ref_lp, atol=1e-4), "log_prob mismatch"

    print("KERNEL_OK")
</pallas_src>

<mosaic_0001>
module attributes {stable_mosaic.version = 11 : i64} {
  func.func @_policy_kernel(%arg0: i32, %arg1: memref<1x8x1xi32, #tpu.memory_space<vmem>>, %arg2: memref<1x8x128xf32, #tpu.memory_space<vmem>>, %arg3: memref<128x128xbf16, #tpu.memory_space<vmem>>, %arg4: memref<272x128xbf16, #tpu.memory_space<vmem>>, %arg5: memref<1x8x128xf32, #tpu.memory_space<vmem>>) attributes {dimension_semantics = [#tpu.dimension_semantics<parallel>], iteration_bounds = array<i64: 4>, scalar_prefetch = 0 : i64, scratch_operands = 0 : i64, tpu.core_type = #tpu.core_type<tc>, window_params = [{transform_indices = @transform_0, window_bounds = array<i64: 1, 8, 1>}, {transform_indices = @transform_1, window_bounds = array<i64: 1, 8, 128>}, {pipeline_mode = #tpu.pipeline_mode<synchronous>, transform_indices = @transform_2, window_bounds = array<i64: 128, 128>}, {pipeline_mode = #tpu.pipeline_mode<synchronous>, transform_indices = @transform_3, window_bounds = array<i64: 272, 128>}, {transform_indices = @transform_4, window_bounds = array<i64: 1, 8, 128>}]} {
    %c0 = arith.constant 0 : index
    %c0_0 = arith.constant 0 : index
    %c0_1 = arith.constant 0 : index
    %0 = vector.load %arg1[%c0, %c0_0, %c0_1] : memref<1x8x1xi32, #tpu.memory_space<vmem>>, vector<1x8x1xi32>
    %1 = vector.shape_cast %0 : vector<1x8x1xi32> to vector<8x1xi32>
    %c0_2 = arith.constant 0 : index
    %c0_3 = arith.constant 0 : index
    %c0_4 = arith.constant 0 : index
    %2 = vector.load %arg2[%c0_2, %c0_3, %c0_4] : memref<1x8x128xf32, #tpu.memory_space<vmem>>, vector<1x8x128xf32>
    %3 = vector.shape_cast %2 : vector<1x8x128xf32> to vector<8x128xf32>
    %4 = tpu.iota {dimensions = array<i32: 1>} : vector<8x128xi32>
    %5 = vector.broadcast %1 : vector<8x1xi32> to vector<8x128xi32>
    %6 = arith.cmpi eq, %4, %5 : vector<8x128xi32>
    %7 = arith.extui %6 : vector<8x128xi1> to vector<8x128xi32>
    %8 = arith.sitofp %7 : vector<8x128xi32> to vector<8x128xf32>
    %9 = arith.truncf %8 : vector<8x128xf32> to vector<8x128xbf16>
    %c0_5 = arith.constant 0 : index
    %c0_6 = arith.constant 0 : index
    %10 = vector.load %arg3[%c0_5, %c0_6] : memref<128x128xbf16, #tpu.memory_space<vmem>>, vector<128x128xbf16>
    %cst = arith.constant dense<0.000000e+00> : vector<8x128xf32>
    %11 = tpu.matmul %9, %10, %cst {dimension_numbers = #tpu.dot_dimension_numbers<[1], [0], [0], [1], [0, 0, 1, 1], [], []>} : vector<8x128xbf16>, vector<128x128xbf16>, vector<8x128xf32> -> vector<8x128xf32>
    %cst_7 = arith.constant 0.000000e+00 : f32
    %12 = vector.broadcast %cst_7 : f32 to vector<8x128xf32>
    %13 = arith.maximumf %11, %12 : vector<8x128xf32>
    %c0_8 = arith.constant 0 : index
    %c0_9 = arith.constant 0 : index
    %14 = vector.load %arg4[%c0_8, %c0_9] : memref<272x128xbf16, #tpu.memory_space<vmem>>, vector<128x128xbf16>
    %c128 = arith.constant 128 : index
    %c0_10 = arith.constant 0 : index
    %15 = vector.load %arg4[%c128, %c0_10] : memref<272x128xbf16, #tpu.memory_space<vmem>>, vector<128x128xbf16>
    %c256 = arith.constant 256 : index
    %c0_11 = arith.constant 0 : index
    %16 = vector.load %arg4[%c256, %c0_11] : memref<272x128xbf16, #tpu.memory_space<vmem>>, vector<1x128xbf16>
    %17 = arith.extf %16 : vector<1x128xbf16> to vector<1x128xf32>
    %c257 = arith.constant 257 : index
    %c0_12 = arith.constant 0 : index
    %18 = vector.load %arg4[%c257, %c0_12] : memref<272x128xbf16, #tpu.memory_space<vmem>>, vector<1x128xbf16>
    %19 = arith.extf %18 : vector<1x128xbf16> to vector<1x128xf32>
    %20 = arith.truncf %13 : vector<8x128xf32> to vector<8x128xbf16>
    %cst_13 = arith.constant dense<0.000000e+00> : vector<8x128xf32>
    %21 = tpu.matmul %20, %14, %cst_13 {dimension_numbers = #tpu.dot_dimension_numbers<[1], [0], [0], [1], [0, 0, 1, 1], [], []>} : vector<8x128xbf16>, vector<128x128xbf16>, vector<8x128xf32> -> vector<8x128xf32>
    %22 = vector.broadcast %17 : vector<1x128xf32> to vector<8x128xf32>
    %23 = arith.addf %21, %22 : vector<8x128xf32>
    %cst_14 = arith.constant 0.000000e+00 : f32
    %24 = vector.broadcast %cst_14 : f32 to vector<8x128xf32>
    %25 = arith.maximumf %23, %24 : vector<8x128xf32>
    %26 = arith.truncf %25 : vector<8x128xf32> to vector<8x128xbf16>
    %cst_15 = arith.constant dense<0.000000e+00> : vector<8x128xf32>
    %27 = tpu.matmul %26, %15, %cst_15 {dimension_numbers = #tpu.dot_dimension_numbers<[1], [0], [0], [1], [0, 0, 1, 1], [], []>} : vector<8x128xbf16>, vector<128x128xbf16>, vector<8x128xf32> -> vector<8x128xf32>
    %28 = vector.broadcast %19 : vector<1x128xf32> to vector<8x128xf32>
    %29 = arith.addf %27, %28 : vector<8x128xf32>
    %30 = tpu.iota {dimensions = array<i32: 1>} : vector<8x128xi32>
    %c5_i32 = arith.constant 5 : i32
    %31 = vector.broadcast %c5_i32 : i32 to vector<8x128xi32>
    %32 = arith.cmpi slt, %30, %31 : vector<8x128xi32>
    %cst_16 = arith.constant -1.000000e+30 : f32
    %33 = vector.broadcast %cst_16 : f32 to vector<8x128xf32>
    %34 = arith.select %32, %29, %33 : vector<8x128xi1>, vector<8x128xf32>
    %35 = arith.addf %34, %3 : vector<8x128xf32>
    %36 = tpu.reduce_index %35 {axis = 1 : i32, kind = #tpu.reduction_kind<arg_max>} : vector<8x128xf32> -> vector<8xi32>
    %37 = vector.shape_cast %36 : vector<8xi32> to vector<8x1xi32>
    %cst_17 = arith.constant dense<0xFF800000> : vector<8xf32>
    %38 = vector.multi_reduction <maximumf>, %34, %cst_17 [1] : vector<8x128xf32> to vector<8xf32>
    %39 = vector.shape_cast %38 : vector<8xf32> to vector<8x1xf32>
    %40 = vector.broadcast %39 : vector<8x1xf32> to vector<8x128xf32>
    %41 = arith.subf %34, %40 : vector<8x128xf32>
    %42 = math.exp %41 : vector<8x128xf32>
    %cst_18 = arith.constant dense<0.000000e+00> : vector<8xf32>
    %43 = vector.multi_reduction <add>, %42, %cst_18 [1] : vector<8x128xf32> to vector<8xf32>
    %44 = vector.shape_cast %43 : vector<8xf32> to vector<8x1xf32>
    %45 = math.log %44 : vector<8x1xf32>
    %46 = arith.addf %39, %45 : vector<8x1xf32>
    %47 = vector.broadcast %37 : vector<8x1xi32> to vector<8x128xi32>
    %48 = arith.cmpi eq, %30, %47 : vector<8x128xi32>
    %49 = arith.extui %48 : vector<8x128xi1> to vector<8x128xi32>
    %50 = arith.sitofp %49 : vector<8x128xi32> to vector<8x128xf32>
    %51 = arith.mulf %34, %50 : vector<8x128xf32>
    %cst_19 = arith.constant dense<0.000000e+00> : vector<8xf32>
    %52 = vector.multi_reduction <add>, %51, %cst_19 [1] : vector<8x128xf32> to vector<8xf32>
    %53 = vector.shape_cast %52 : vector<8xf32> to vector<8x1xf32>
    %54 = arith.subf %53, %46 : vector<8x1xf32>
    %55 = tpu.iota {dimensions = array<i32: 0>} : vector<8x1xi32>
    %c8_i32 = arith.constant 8 : i32
    %56 = vector.broadcast %c8_i32 : i32 to vector<8x1xi32>
    %57 = arith.cmpi slt, %55, %56 : vector<8x1xi32>
    %58 = arith.extui %57 : vector<8x1xi1> to vector<8x1xi32>
    %59 = arith.sitofp %58 : vector<8x1xi32> to vector<8x1xf32>
    %60 = arith.mulf %54, %59 : vector<8x1xf32>
    %61 = vector.shape_cast %60 : vector<8x1xf32> to vector<1x8x1xf32>
    %cst_20 = arith.constant dense<0.000000e+00> : vector<1xf32>
    %62 = vector.multi_reduction <add>, %61, %cst_20 [1, 2] : vector<1x8x1xf32> to vector<1xf32>
    %63 = vector.shape_cast %62 : vector<1xf32> to vector<1x1x1xf32>
    %64 = vector.extract %63[0, 0, 0] : f32 from vector<1x1x1xf32>
    %cst_21 = arith.constant 8.000000e+00 : f32
    %65 = arith.divf %64, %cst_21 : f32
    %c126_i32 = arith.constant 126 : i32
    %66 = vector.broadcast %c126_i32 : i32 to vector<8x128xi32>
    %67 = arith.cmpi eq, %30, %66 : vector<8x128xi32>
    %68 = arith.sitofp %37 : vector<8x1xi32> to vector<8x1xf32>
    %69 = vector.shape_cast %68 : vector<8x1xf32> to vector<8x1xf32>
    %70 = vector.broadcast %69 : vector<8x1xf32> to vector<8x128xf32>
    %71 = arith.select %67, %70, %29 : vector<8x128xi1>, vector<8x128xf32>
    %c127_i32 = arith.constant 127 : i32
    %72 = vector.broadcast %c127_i32 : i32 to vector<8x128xi32>
    %73 = arith.cmpi eq, %30, %72 : vector<8x128xi32>
    %74 = vector.broadcast %65 : f32 to vector<8x128xf32>
    %75 = arith.select %73, %74, %71 : vector<8x128xi1>, vector<8x128xf32>
    %c0_22 = arith.constant 0 : index
    %c0_23 = arith.constant 0 : index
    %c0_24 = arith.constant 0 : index
    %76 = vector.load %arg5[%c0_22, %c0_23, %c0_24] : memref<1x8x128xf32, #tpu.memory_space<vmem>>, vector<1x8x128xf32>
    %77 = vector.shape_cast %76 : vector<1x8x128xf32> to vector<8x128xf32>
    %78 = vector.shape_cast %75 : vector<8x128xf32> to vector<1x8x128xf32>
    tpu.vector_store %arg5[%c0_22, %c0_23, %c0_24], %78 {strides = array<i32>} : memref<1x8x128xf32, #tpu.memory_space<vmem>>, vector<1x8x128xf32>,
    return
  }
  func.func @transform_0(%arg0: i32) -> (i32, i32, i32) {
    %c0_i32 = arith.constant 0 : i32
    %c0_i32_0 = arith.constant 0 : i32
    %c0_i32_1 = arith.constant 0 : i32
    return %arg0, %c0_i32, %c0_i32_0 : i32, i32, i32
  }
  func.func @transform_1(%arg0: i32) -> (i32, i32, i32) {
    %c0_i32 = arith.constant 0 : i32
    %c0_i32_0 = arith.constant 0 : i32
    %c0_i32_1 = arith.constant 0 : i32
    return %arg0, %c0_i32, %c0_i32_0 : i32, i32, i32
  }
  func.func @transform_2(%arg0: i32) -> (i32, i32) {
    %c0_i32 = arith.constant 0 : i32
    %c0_i32_0 = arith.constant 0 : i32
    %c0_i32_1 = arith.constant 0 : i32
    return %c0_i32, %c0_i32_0 : i32, i32
  }
  func.func @transform_3(%arg0: i32) -> (i32, i32) {
    %c0_i32 = arith.constant 0 : i32
    %c0_i32_0 = arith.constant 0 : i32
    %c0_i32_1 = arith.constant 0 : i32
    return %c0_i32, %c0_i32_0 : i32, i32
  }
  func.func @transform_4(%arg0: i32) -> (i32, i32, i32) {
    %c0_i32 = arith.constant 0 : i32
    %c0_i32_0 = arith.constant 0 : i32
    %c0_i32_1 = arith.constant 0 : i32
    return %arg0, %c0_i32, %c0_i32_0 : i32, i32, i32
  }
}

</mosaic_0001>

<bundles_post_ra>
// kernel: categorical_policy_rollout.1
= control target key start
LH: loop header
LB: loop body
LE: loop exit
PB: predicated region body
PF: predicated region fallthrough
CT: control target
= control target key end

     0   :  { %9 = vsyncpa [#allocation3], 0  ;;  %s1118_s0 = inlined_call_operand.vmem [shape: s32[4,8,1], index: 0, kind: input, shape index: {}]   ;;  %s1119_s1 = inlined_call_operand.vmem [shape: f32[4,8,128], index: 1, kind: input, shape index: {}]   ;;  %s1120_s2 = inlined_call_operand.hbm [shape: bf16[128,128], index: 2, kind: input, shape index: {}]   ;;  %s1121_s3 = inlined_call_operand.hbm [shape: bf16[272,128], index: 3, kind: input, shape index: {}]   ;;  %s1122_s4 = inlined_call_operand.vmem [shape: f32[4,8,128], index: 4, kind: output, shape index: {}]  }
   0x1   :  { %10 = vsyncpa [#allocation5], 0  ;;  %s1010_s15 = smov 0  }
   0x2 LB: > { %s1016_s16 = sadd.s32 4294967295, %s975_s15   ;;  %p716_p0 = scmp.ge.s32.totalorder %s975_s15, 1  ;;  %s975_s15 = sphi %s1010_s15, %s16_s15  }
   0x3   : > { %p141_p1 = scmp.lt.s32.totalorder %s975_s15, 5  ;;  %s977_s17 = smov [#allocation2]  }
   0x4   : > { %s153_s18 = sshll.u32 %s977_s17, 4  ;;  %p860_p3 = scmp.eq.s32.totalorder %s1016_s16, 0  ;;  %s154_s18 = int_to_ptr.vmem [resolvable:$true] %s153_s18 }
   0x5   : > { %p1020_p2 = pnand %p716_p0, %p141_p1  ;;  %s978_s20 = smov [#allocation4]  }
   0x6   : > { %s166_s21 = sshll.u32 %s978_s20, 4  ;;  %s920_s23 = scalar_lea.vmem %s154_s18, 1024  ;;  %s167_s21 = int_to_ptr.vmem [resolvable:$true] %s166_s21 }
   0x7   : > { %p853_p4 = pneg %p1020_p2  ;;  %p921_p7 = scmp.ne.s32.totalorder %s154_s18, %s920_s23 }
   0x8   : > { %p928_p10 = scmp.lt.s32.totalorder %s154_s18, %s154_s18  ;;  %p929_p11 = scmp.lt.s32.totalorder %s920_s23, %s920_s23 }
   0x9   : > { %p1029_p5 = pnand %p860_p3, %p853_p4 }
   0xa   : > { %p930_p12 = por %p929_p11, %p928_p10 }
   0xb   : > { %p911_p6 = pneg %p1029_p5 }
   0xd   : > { %p923_p8 = pnand %p921_p7, %p911_p6 }
   0xf   : > { %p924_p9 = pneg %p923_p8 }
  0x11   : > { %p931_p13 = pnand %p930_p12, %p924_p9 }
  0x13   : > { %934 = shalt.err (!%p931_p13)
}
  0x14   : > { %s979_s24 = smov 64   ;;  %s980_s25 = smov 4  }
  0x15   : > { %856 = dma.hbm_to_vmem [thread:$0]  (!%p1029_p5), %s1120_s2, 1024, %s154_s18, [#allocation3], %s979_s24, %s979_s24, %s980_s25  }
  0x16   : > { %s946_s28 = scalar_lea.vmem %s167_s21, 2176  ;;  %p954_p7 = scmp.lt.s32.totalorder %s167_s21, %s167_s21 }
  0x17   : > { %p947_p0 = scmp.ne.s32.totalorder %s167_s21, %s946_s28  ;;  %p955_p8 = scmp.lt.s32.totalorder %s946_s28, %s946_s28 }
  0x19   : > { %p949_p1 = pnand %p947_p0, %p911_p6  ;;  %p956_p10 = por %p955_p8, %p954_p7 }
  0x1b   : > { %p950_p4 = pneg %p949_p1 }
  0x1d   : > { %p957_p9 = pnand %p956_p10, %p950_p4 }
  0x1f   : > { %960 = shalt.err (!%p957_p9)
}
  0x20   : > { %859 = dma.hbm_to_vmem [thread:$0]  (!%p1029_p5), %s1121_s3, 2176, %s167_s21, [#allocation5], %s979_s24, %s979_s24, %s980_s25  }
  0x21   : > { %196 = sbr.rel (%p1020_p2) target bundleno = 1285 (0x505), region = 36 }
  0x26   : > { %966 = dma.done.wait (%p860_p3), [#allocation3], 1024  }
  0x27   : > { %968 = vsyncadd (%p860_p3), [#allocation3], 4294966272 }
  0x28   : > { %970 = dma.done.wait (%p860_p3), [#allocation5], 2176  }
  0x29   : > { %972 = vsyncadd (%p860_p3), [#allocation5], 4294965120  ;;  %p228_p6 = scmp.lt.s32.totalorder %s1016_s16, 3  ;;  %v981_v0 = vmov 0   ;;  %v982_v1 = vmov 0.0   ;;  %vm983_vm0 = vmmov 0   ;;  %v243_v18 = vlaneseq }
  0x2a   : > { %880 = vset.pattern.permute.xlu0 %v981_v0  ;;  %783 = vmatprep.subr.bf16.mxu0 %v982_v1  ;;  %v881_v3 = vld [vmem:[#allocation2 + $0x38] sm:$0xff]   ;;  %v882_v4 = vld [vmem:[#allocation2 + $0x30] sm:$0xff]   ;;  %v883_v5 = vld [vmem:[#allocation2 + $0x28] sm:$0xff]   ;;  %v984_v21 = vmov 1.0|1.0   ;;  %vm606_vm5 = vcmask 7168  }
  0x2b   : > { %s1126_s16 = smov (!%p228_p6, %s1016_s16), 3  ;;  %803 = vmatprep.subr.bf16.mxu1 %v982_v1  ;;  %799 = vmatprep.mubr.msk.bf16.mxu0 %vm983_vm0, %v982_v1  ;;  %v889_v6 = vld [vmem:[#allocation4 + $0x38] sm:$0xff]   ;;  %v884_v7 = vld [vmem:[#allocation2 + $0x20] sm:$0xff]   ;;  %v890_v8 = vld [vmem:[#allocation4 + $0x30] sm:$0xff]   ;;  %v1090_v19 = vand.u32 127, %v243_v18  ;;  %v393_v37 = vshrl.u32 %v243_v18, 7 }
  0x2c   : > { %s1065_s5 = sshll.u32 %s1126_s16, 3  ;;  %819 = vmatprep.mubr.msk.bf16.mxu1 %vm983_vm0, %v982_v1  ;;  %784 = vmatpush3.bf16.msra.mxu0 %v881_v3  ;;  %v885_v9 = vld [vmem:[#allocation2 + $0x18] sm:$0xff]   ;;  %v891_v10 = vld [vmem:[#allocation4 + $0x28] sm:$0xff]   ;;  %v886_v11 = vld [vmem:[#allocation2 + $0x10] sm:$0xff]  }
  0x2d   : > { %s231_s8 = scalar_lea.vmem %s1118_s0, %s1065_s5  ;;  %785 = vmatprep.subr.bf16.mxu0 %v982_v1  ;;  %804 = vmatpush3.bf16.msra.mxu1 %v889_v6  ;;  %v892_v12 = vld [vmem:[#allocation4 + $0x20] sm:$0xff]   ;;  %v887_v13 = vld [vmem:[#allocation2 + $0x8] sm:$0xff]   ;;  %v893_v14 = vld [vmem:[#allocation4 + $0x18] sm:$0xff]   ;;  %v394_v40 = vsub.s32 0, %v393_v37  ;;  %v488_v49 = vsub.s32 1, %v393_v37  ;;  %s235_s11 = scalar_lea.vmem %s1119_s1, %s1065_s5  ;;  %vm578_vm3 = vcmp.lt.s32.totalorder %v1090_v19, 5 }
  0x2e   : > { %v241_v2 = vld [vmem:[%s231_s8] sm:$0xff]  ;;  %805 = vmatprep.subr.bf16.mxu1 %v982_v1  ;;  %v894_v16 = vld [vmem:[#allocation4 + $0x10] sm:$0xff]   ;;  %v895_v17 = vld [vmem:[#allocation4 + $0x8] sm:$0xff]   ;;  %vm620_vm6 = vcmp.eq.s32.totalorder %v1090_v19, 126  ;;  %vm623_vm7 = vcmp.eq.s32.totalorder %v1090_v19, 127  ;;  %s239_s17 = scalar_lea.vmem %s1122_s4, %s1065_s5 }
  0x2f   : > { %246 = vperm.xlu0 %880, %v241_v2   ;;  %v888_v15 = vld [vmem:[#allocation2] sm:$0xff]   ;;  %v897_v23 = vld [vmem:[#allocation4 + $0x78] sm:$0xff]   ;;  %v898_v24 = vld [vmem:[#allocation4 + $0x70] sm:$0xff]  }
  0x30   : > { %786 = vmatpush3.bf16.msra.mxu0 %v882_v4  ;;  %v896_v22 = vld [vmem:[#allocation4] sm:$0xff]   ;;  %v899_v25 = vld [vmem:[#allocation4 + $0x68] sm:$0xff]   ;;  %v901_v27 = vld [vmem:[#allocation4 + $0x58] sm:$0xff]  }
  0x31   : > { %787 = vmatprep.subr.bf16.mxu0 %v982_v1  ;;  %806 = vmatpush3.bf16.msra.mxu1 %v890_v8  ;;  %v900_v26 = vld [vmem:[#allocation4 + $0x60] sm:$0xff]   ;;  %v902_v28 = vld [vmem:[#allocation4 + $0x50] sm:$0xff]   ;;  %v903_v35 = vld [vmem:[#allocation4 + $0x48] sm:$0xff]  }
  0x32   : > { %807 = vmatprep.subr.bf16.mxu1 %v982_v1  ;;  %v904_v36 = vld [vmem:[#allocation4 + $0x40] sm:$0xff]  }
  0x33   : > { %v389_v38 = vld [vmem:[#allocation4 + $0x80] sm:$0x1] }
  0x34   : > { %788 = vmatpush3.bf16.msra.mxu0 %v883_v5  ;;  %v390_v39 = vunpack.c.l.bf16 %v389_v38  ;;  %v242_v53 = vld [vmem:[%s235_s11] sm:$0xff] }
  0x35   : > { %789 = vmatprep.subr.bf16.mxu0 %v982_v1  ;;  %808 = vmatpush3.bf16.msra.mxu1 %v891_v10 }
  0x36   : > { %809 = vmatprep.subr.bf16.mxu1 %v982_v1  ;;  %v395_v41 = vrot.slane %v390_v39, %v394_v40  ;;  %v489_v50 = vrot.slane %v390_v39, %v488_v49 }
  0x38   : > { %790 = vmatpush3.bf16.msra.mxu0 %v884_v7 }
  0x39   : > { %791 = vmatprep.subr.bf16.mxu0 %v982_v1  ;;  %810 = vmatpush3.bf16.msra.mxu1 %v892_v12 }
  0x3a   : > { %811 = vmatprep.subr.bf16.mxu1 %v982_v1 }
  0x3c   : > { %792 = vmatpush3.bf16.msra.mxu0 %v885_v9 }
  0x3d   : > { %793 = vmatprep.subr.bf16.mxu0 %v982_v1  ;;  %812 = vmatpush3.bf16.msra.mxu1 %v893_v14 }
  0x3e   : > { %813 = vmatprep.subr.bf16.mxu1 %v982_v1 }
  0x40   : > { %794 = vmatpush3.bf16.msra.mxu0 %v886_v11 }
  0x41   : > { %795 = vmatprep.subr.bf16.mxu0 %v982_v1  ;;  %814 = vmatpush3.bf16.msra.mxu1 %v894_v16 }
  0x42   : > { %815 = vmatprep.subr.bf16.mxu1 %v982_v1 }
  0x44   : > { %796 = vmatpush3.bf16.msra.mxu0 %v887_v13 }
  0x45   : > { %797 = vmatprep.subr.bf16.mxu0 %v982_v1  ;;  %816 = vmatpush3.bf16.msra.mxu1 %v895_v17 }
  0x46   : > { %817 = vmatprep.subr.bf16.mxu1 %v982_v1 }
  0x48   : > { %798 = vmatpush3.bf16.msra.mxu0 %v888_v15 }
  0x49   : > { %823 = vmatprep.subr.bf16.mxu0 %v982_v1  ;;  %818 = vmatpush3.bf16.msra.mxu1 %v896_v22 }
  0xaa   : > { %v247_v20 = vpop.permute.xlu0 %246 }
  0xab   : > { %vm248_vm1 = vcmp.eq.s32.totalorder %v1090_v19, %v247_v20 }
  0xac   : > { %vm735_vm2 = vmpackc.low %vm248_vm1, %vm248_vm1 }
  0xad   : > { %800 = vmatmul.mubr.msk.bf16.vlgmr.msra.gmra.mxu0 %vm735_vm2, %v984_v21 }
  0xae   : > { %839 = vmatprep.mubr.msk.bf16.mxu0 %vm983_vm0, %v982_v1  ;;  %824 = vmatpush3.bf16.msra.mxu0 %v897_v23 }
  0xaf   : > { %825 = vmatprep.subr.bf16.mxu0 %v982_v1 }
  0xb2   : > { %826 = vmatpush3.bf16.msra.mxu0 %v898_v24 }
  0xb3   : > { %827 = vmatprep.subr.bf16.mxu0 %v982_v1 }
  0xb6   : > { %828 = vmatpush3.bf16.msra.mxu0 %v899_v25 }
  0xb7   : > { %829 = vmatprep.subr.bf16.mxu0 %v982_v1 }
  0xba   : > { %830 = vmatpush3.bf16.msra.mxu0 %v900_v26 }
  0xbb   : > { %831 = vmatprep.subr.bf16.mxu0 %v982_v1 }
  0xbe   : > { %832 = vmatpush3.bf16.msra.mxu0 %v901_v27 }
  0xbf   : > { %833 = vmatprep.subr.bf16.mxu0 %v982_v1 }
  0xc2   : > { %834 = vmatpush3.bf16.msra.mxu0 %v902_v28 }
  0xc3   : > { %835 = vmatprep.subr.bf16.mxu0 %v982_v1 }
  0xc6   : > { %836 = vmatpush3.bf16.msra.mxu0 %v903_v35 }
  0xc7   : > { %837 = vmatprep.subr.bf16.mxu0 %v982_v1 }
  0xca   : > { %838 = vmatpush3.bf16.msra.mxu0 %v904_v36 }
 0x16d   : > { %v350_v29 = vpop.f32.mrf.mxu0 }
 0x16e   : > { %v356_v30 = vmax.f32 %v350_v29, 0.0 }
 0x16f   : > { %v801_v31 = vpop.f32.mrf.mxu0 }
 0x170   : > { %v391_v32 = vpack.c.bf16 %v356_v30, %v356_v30 }
 0x171   : > { %v353_v33 = vpop.f32.mrf.mxu0 }
 0x172   : > { %820 = vmatmul.mubr.bf16.vlgmr.msra.gmra.mxu1 %v391_v32 }
 0x173   : > { %v802_v34 = vpop.f32.mrf.mxu0 }
 0x232   : > { %v478_v42 = vpop.f32.mrf.mxu1 }
 0x233   : > { %v479_v43 = vadd.f32 %v478_v42, %v395_v41 }
 0x234   : > { %v821_v44 = vpop.f32.mrf.mxu1 }
 0x235   : > { %v484_v45 = vmax.f32 %v479_v43, 0.0 }
 0x236   : > { %v481_v46 = vpop.f32.mrf.mxu1 }
 0x237   : > { %v485_v47 = vpack.c.bf16 %v484_v45, %v484_v45 }
 0x238   : > { %v822_v48 = vpop.f32.mrf.mxu1 }
 0x239   : > { %840 = vmatmul.mubr.bf16.vlgmr.msra.gmra.mxu0 %v485_v47 }
 0x2f9   : > { %v572_v51 = vpop.f32.mrf.mxu0 }
 0x2fa   : > { %v573_v52 = vadd.f32 %v572_v51, %v489_v50 }
 0x2fb   : > { %v841_v54 = vpop.f32.mrf.mxu0 }
 0x2fc   : > { %v579_v55 = vsel %vm578_vm3, %v573_v52, -1e+30 }
 0x2fd   : > { %583 = vmax.xlane.f32.xlu0 %v579_v55  ;;  %v575_v56 = vpop.f32.mrf.mxu0  ;;  %v580_v57 = vadd.f32 %v579_v55, %v242_v53 }
 0x2ff   : > { %581 = vmax.index.xlane.f32.xlu1 %v580_v57  ;;  %v842_v58 = vpop.f32.mrf.mxu0 }
 0x386   : > { %v584_v59 = vpop.xlane.xlu0 %583 }
 0x387   : > { %v585_v60 = vsub.f32 %v579_v55, %v584_v59 }
 0x388   : > { %v582_v62 = vpop.xlane.xlu1 %581 }
 0x389   : > { %v586_v61 = vmul.f32 1.442695, %v585_v60  ;;  %vm593_vm4 = vcmp.eq.s32.totalorder %v1090_v19, %v582_v62  ;;  %v621_v16 = vcvt.s32.f32 %v582_v62 }
 0x38a   : > { %v753_v0 = vsel %vm593_vm4, 1.0, %v982_v1 }
 0x38b   : > { %905 = vpow2.f32 %v586_v61  ;;  %v596_v2 = vmul.f32 %v753_v0, %v579_v55  ;;  %v622_v17 = vsel %vm620_vm6, %v621_v16, %v573_v52 }
 0x398   : > { %v906_v63 = vpop.eup %905 }
 0x399   : > { %588 = vadd.xlane.f32.xlu1 %v906_v63 }
 0x39d   : > { %597 = vadd.xlane.f32.xlu1 %v596_v2 }
 0x422   : > { %v589_v3 = vpop.xlane.xlu1 %588 }
 0x423   : > { %907 = vlog2.f32 %v589_v3 }
 0x426   : > { %v598_v7 = vpop.xlane.xlu1 %597 }
 0x430   : > { %v908_v4 = vpop.eup %907 }
 0x431   : > { %v591_v5 = vmul.f32 0.6931472, %v908_v4 }
 0x433   : > { %v592_v6 = vadd.f32 %v591_v5, %v584_v59 }
 0x435   : > { %v599_v8 = vsub.f32 %v598_v7, %v592_v6 }
 0x437   : > { %v607_v9 = vsel %vm606_vm5, %v599_v8, 0.0 }
 0x438   : > { %608 = vadd.xlane.f32.xlu1 %v607_v9 }
 0x4c1   : > { %v609_v10 = vpop.xlane.xlu1 %608 }
 0x4c2   : > { %v610_v11 = vrot.slane %v609_v10, 4 }
 0x4c4   : > { %v611_v12 = vadd.f32 %v610_v11, %v609_v10 }
 0x4c6   : > { %v612_v13 = vrot.slane %v611_v12, 2 }
 0x4c8   : > { %v613_v14 = vadd.f32 %v612_v13, %v611_v12 }
 0x4ca   : > { %v614_v1 = vrot.slane %v613_v14, 1 }
 0x4cc   : > { %v615_v15 = vadd.f32 %v614_v1, %v613_v14 }
 0x4ce   : > { %843 = vpush %v615_v15 }
 0x4ff   : > { %s844_s12 = spop %843 }
 0x500   : > { %s619_s13 = smul.f32 0.125, %s844_s12 }
 0x502   : > { %v624_v18 = vstv %s619_s13 }
 0x503   : > { %v625_v20 = vsel %vm623_vm7, %v624_v18, %v622_v17 }
 0x504   : > { %626 = vst [vmem:[%s239_s17] sm:$0xff] %v625_v20 }
 0x505 PF: > { %s16_s15 = sadd.s32 1, %s975_s15  }
 0x506   : > { %p13_p2 = scmp.ge.s32.totalorder %s16_s15, 6  }
 0x508   :  { %15 = sbr.rel (!%p13_p2) target bundleno = 2 (0x2), region = 78 }
 0x50d   :  { %646 = vsyncpa [#allocation3], 1 }
 0x50e   :  { %648 = vsyncpa [#allocation3 + $0x1], 1 }
 0x50f   :  { %649 = vsyncpa [#allocation5], 1 }

</bundles_post_ra>
